<compile_context>
chip_gen: v7x
topology: tpu7x:2x2x1
jax: 0.10.0
libtpu: 0.0.40
codegen_flags: <defaults>
</compile_context>

<pallas_src>
import functools

import jax
import jax.numpy as jnp
from jax.experimental import pallas as pl
from jax.experimental.pallas import tpu as pltpu

TEMPERATURE = 512 ** 0.5  # matches self.temperature = 512 ** 0.5


def _attend(q, kv, o_ref, inv_temperature):
    """q: (TB, tc, Np), kv: (TB, C, Np) in operand dtype; writes (TB, tc, Np)."""
    # Logits: contract over N in the operand dtype, accumulate in f32; fold the
    # temperature scale into the small (tc, C) logits instead of scaling (C, N).
    s = jnp.einsum("bqn,bkn->bqk", q, kv,
                   preferred_element_type=jnp.float32)
    s = s * inv_temperature                            # (TB, tc, C), f32

    # Numerically-stable softmax over the key axis (f32).
    s_max = jnp.max(s, axis=-1, keepdims=True)
    p = jnp.exp(s - s_max)
    denom = jnp.sum(p, axis=-1, keepdims=True)
    p = p * pl.reciprocal(denom, approx=True)          # EUP vrcp slot, ~free

    # output = attn @ v (v == x); feed probabilities in the operand dtype.
    out = jnp.einsum("bqk,bkn->bqn", p.astype(kv.dtype), kv,
                     preferred_element_type=jnp.float32)
    o_ref[...] = out.astype(o_ref.dtype)


def _sdpa_kernel_full(x_ref, o_ref, *, inv_temperature):
    # tc == C: a single slab is simultaneously Q, K and V.
    kv = x_ref[...]
    _attend(kv, kv, o_ref, inv_temperature)


def _sdpa_kernel_tiled(q_ref, x_ref, o_ref, *, inv_temperature):
    # tc < C: query row tile comes from its own BlockSpec; K/V slab is resident.
    _attend(q_ref[...], x_ref[...], o_ref, inv_temperature)


def _choose_row_tile(c):
    """Query-row tile: full C when small, else a multiple-of-8 divisor of C."""
    if c <= 128:
        return c
    for tc in (128, 64, 32, 16, 8):
        if c % tc == 0:
            return tc
    return c


def _choose_batch_tile(b, c, tc, n_padded, itemsize):
    """Largest divisor of B whose pipeline buffers + temporaries fit the budget."""
    budget = 24 * 1024 * 1024  # conservative: well under v7x's 64 MiB VMEM
    best = 1
    q_extra = tc if tc != c else 0
    for tb in range(1, min(b, 16) + 1):
        if b % tb:
            continue
        pipeline = 2 * tb * (c + q_extra + tc) * n_padded * itemsize  # dbl-buffered io
        temps = tb * (2 * tc * n_padded + 3 * tc * c) * 4             # f32 temporaries
        if pipeline + temps <= budget:
            best = tb
    return best


def scaled_dot_product_attention(x, temperature=TEMPERATURE):
    """x: (B, C, H, W) -> (B, C, H, W), matching the PyTorch forward (mask=None)."""
    b, c, h, w = x.shape
    n = h * w
    x_flat = x.reshape(b, c, n)

    # Pad N to a multiple of 128 for lane-dense loads/stores (zero columns add
    # nothing to the logits; the padded output columns are sliced off).
    n_pad = (-n) % 128
    if n_pad:
        x_flat = jnp.pad(x_flat, ((0, 0), (0, 0), (0, n_pad)))
    np_ = n + n_pad

    itemsize = jnp.dtype(x.dtype).itemsize
    tc = _choose_row_tile(c)
    tb = _choose_batch_tile(b, c, tc, np_, itemsize)
    grid = (b // tb, c // tc)
    inv_t = 1.0 / float(temperature)

    if tc == c:
        kernel = functools.partial(_sdpa_kernel_full, inv_temperature=inv_t)
        in_specs = [
            # Single slab acts as Q, K and V.
            pl.BlockSpec((tb, c, np_), lambda bi, ci: (bi, 0, 0)),
        ]
        operands = (x_flat,)
    else:
        kernel = functools.partial(_sdpa_kernel_tiled, inv_temperature=inv_t)
        in_specs = [
            # Query row tile for this grid step.
            pl.BlockSpec((tb, tc, np_), lambda bi, ci: (bi, ci, 0)),
            # K/V slab: constant in the row-tile axis -> resident, one DMA per
            # batch block.
            pl.BlockSpec((tb, c, np_), lambda bi, ci: (bi, 0, 0)),
        ]
        operands = (x_flat, x_flat)

    # Explicit VMEM budget (re-derived per shape; default scoped limits differ
    # per generation: v5e 16 MiB, v6e 32 MiB, v7x 32/64 MiB).
    q_extra = tc if tc != c else 0
    in_block = tb * (c + q_extra) * np_ * itemsize
    out_block = tb * tc * np_ * itemsize
    temps = tb * (2 * tc * np_ + 3 * tc * c) * 4
    est = 2 * (in_block + out_block) + temps + (1 << 20)
    vmem_limit = int(min(48 * 1024 * 1024, max(32 * 1024 * 1024, 2 * est)))

    out_flat = pl.pallas_call(
        kernel,
        out_shape=jax.ShapeDtypeStruct((b, c, np_), x.dtype),
        grid_spec=pltpu.PrefetchScalarGridSpec(
            num_scalar_prefetch=0,
            grid=grid,
            in_specs=in_specs,
            out_specs=pl.BlockSpec((tb, tc, np_), lambda bi, ci: (bi, ci, 0)),
        ),
        compiler_params=pltpu.CompilerParams(
            dimension_semantics=("parallel", "parallel"),
            vmem_limit_bytes=vmem_limit,
        ),
    )(*operands)

    if n_pad:
        out_flat = out_flat[:, :, :n]
    return out_flat.reshape(b, c, h, w)


def _reference(x, temperature=TEMPERATURE):
    b, c, h, w = x.shape
    q = x.reshape(b, c, -1).astype(jnp.float32)
    k = jnp.transpose(q, (0, 2, 1))
    v = q
    attn = jnp.matmul(q / temperature, k)
    attn = jax.nn.softmax(attn, axis=-1)
    out = jnp.matmul(attn, v)
    return out.reshape(b, c, h, w).astype(x.dtype)


if __name__ == "__main__":
    key = jax.random.PRNGKey(0)

    # Primary test: matches the module's expected NCHW shapes.
    B, C, H, W = 2, 4, 16, 16
    x = jax.random.normal(key, (B, C, H, W), dtype=jnp.float32)
    out = jax.block_until_ready(scaled_dot_product_attention(x))
    ref = _reference(x)
    assert out.shape == (B, C, H, W), out.shape
    # approx=True reciprocal introduces ~1e-3 relative error on the softmax.
    assert jnp.allclose(out, ref, atol=5e-3, rtol=5e-3), (
        float(jnp.max(jnp.abs(out - ref)))
    )

    # Second case exercises the N-padding path (H*W = 100 -> padded 128).
    x2 = jax.random.normal(jax.random.fold_in(key, 1), (1, 8, 10, 10),
                           dtype=jnp.float32)
    out2 = jax.block_until_ready(scaled_dot_product_attention(x2))
    ref2 = _reference(x2)
    assert out2.shape == (1, 8, 10, 10), out2.shape
    assert jnp.allclose(out2, ref2, atol=5e-3, rtol=5e-3), (
        float(jnp.max(jnp.abs(out2 - ref2)))
    )

    # Third case exercises the row-tiled path (C > 128 -> query tiles of 128
    # with a resident K/V slab across the row-tile grid axis).
    x3 = jax.random.normal(jax.random.fold_in(key, 2), (1, 256, 8, 8),
                           dtype=jnp.float32)
    out3 = jax.block_until_ready(scaled_dot_product_attention(x3))
    ref3 = _reference(x3)
    assert out3.shape == (1, 256, 8, 8), out3.shape
    assert jnp.allclose(out3, ref3, atol=5e-3, rtol=5e-3), (
        float(jnp.max(jnp.abs(out3 - ref3)))
    )

    print("KERNEL_OK")
</pallas_src>

<mosaic_0001>
module attributes {stable_mosaic.version = 11 : i64} {
  func.func @_sdpa_kernel_full(%arg0: i32, %arg1: i32, %arg2: memref<2x4x256xf32, #tpu.memory_space<vmem>>, %arg3: memref<2x4x256xf32, #tpu.memory_space<vmem>>) attributes {dimension_semantics = [#tpu.dimension_semantics<parallel>, #tpu.dimension_semantics<parallel>], iteration_bounds = array<i64: 1, 1>, scalar_prefetch = 0 : i64, scratch_operands = 0 : i64, tpu.core_type = #tpu.core_type<tc>, window_params = [{transform_indices = @transform_0, window_bounds = array<i64: 2, 4, 256>}, {transform_indices = @transform_1, window_bounds = array<i64: 2, 4, 256>}]} {
    %c0 = arith.constant 0 : index
    %c0_0 = arith.constant 0 : index
    %c0_1 = arith.constant 0 : index
    %0 = vector.load %arg2[%c0, %c0_0, %c0_1] : memref<2x4x256xf32, #tpu.memory_space<vmem>>, vector<2x4x256xf32>
    "tpu.trace_start"() <{level = 10 : i32, message = "bqn,bkn->bqk"}> : () -> ()
    %cst = arith.constant dense<0.000000e+00> : vector<2x4x4xf32>
    %1 = tpu.matmul %0, %0, %cst {dimension_numbers = #tpu.dot_dimension_numbers<[2], [2], [1], [1], [0, 0, 0, 1, 1, 1], [0], [0]>} : vector<2x4x256xf32>, vector<2x4x256xf32>, vector<2x4x4xf32> -> vector<2x4x4xf32>
    "tpu.trace_stop"() : () -> ()
    %cst_2 = arith.constant 0.0441941731 : f32
    %2 = vector.broadcast %cst_2 : f32 to vector<2x4x4xf32>
    %3 = arith.mulf %1, %2 : vector<2x4x4xf32>
    %cst_3 = arith.constant dense<0xFF800000> : vector<2x4xf32>
    %4 = vector.multi_reduction <maximumf>, %3, %cst_3 [2] : vector<2x4x4xf32> to vector<2x4xf32>
    %5 = vector.shape_cast %4 : vector<2x4xf32> to vector<2x4x1xf32>
    %6 = vector.broadcast %5 : vector<2x4x1xf32> to vector<2x4x4xf32>
    %7 = arith.subf %3, %6 : vector<2x4x4xf32>
    %8 = math.exp %7 : vector<2x4x4xf32>
    %cst_4 = arith.constant dense<0.000000e+00> : vector<2x4xf32>
    %9 = vector.multi_reduction <add>, %8, %cst_4 [2] : vector<2x4x4xf32> to vector<2x4xf32>
    %10 = vector.shape_cast %9 : vector<2x4xf32> to vector<2x4x1xf32>
    %11 = tpu.reciprocal %10 {approx = true} : vector<2x4x1xf32> -> vector<2x4x1xf32>
    %12 = vector.broadcast %11 : vector<2x4x1xf32> to vector<2x4x4xf32>
    %13 = arith.mulf %8, %12 : vector<2x4x4xf32>
    "tpu.trace_start"() <{level = 10 : i32, message = "bqk,bkn->bqn"}> : () -> ()
    %cst_5 = arith.constant dense<0.000000e+00> : vector<2x4x256xf32>
    %14 = tpu.matmul %13, %0, %cst_5 {dimension_numbers = #tpu.dot_dimension_numbers<[2], [1], [1], [2], [0, 0, 0, 1, 1, 2], [0], [0]>} : vector<2x4x4xf32>, vector<2x4x256xf32>, vector<2x4x256xf32> -> vector<2x4x256xf32>
    "tpu.trace_stop"() : () -> ()
    %c0_6 = arith.constant 0 : index
    %c0_7 = arith.constant 0 : index
    %c0_8 = arith.constant 0 : index
    %15 = vector.load %arg3[%c0_6, %c0_7, %c0_8] : memref<2x4x256xf32, #tpu.memory_space<vmem>>, vector<2x4x256xf32>
    tpu.vector_store %arg3[%c0_6, %c0_7, %c0_8], %14 {strides = array<i32>} : memref<2x4x256xf32, #tpu.memory_space<vmem>>, vector<2x4x256xf32>,
    return
  }
  func.func @transform_0(%arg0: i32, %arg1: i32) -> (i32, i32, i32) {
    %c0_i32 = arith.constant 0 : i32
    %c0_i32_0 = arith.constant 0 : i32
    %c0_i32_1 = arith.constant 0 : i32
    return %arg0, %c0_i32, %c0_i32_0 : i32, i32, i32
  }
  func.func @transform_1(%arg0: i32, %arg1: i32) -> (i32, i32, i32) {
    %c0_i32 = arith.constant 0 : i32
    %c0_i32_0 = arith.constant 0 : i32
    return %arg0, %arg1, %c0_i32 : i32, i32, i32
  }
}

</mosaic_0001>

<bundles_post_ra>
// kernel: tpu_custom_call.1
= control target key start
LH: loop header
LB: loop body
LE: loop exit
PB: predicated region body
PF: predicated region fallthrough
CT: control target
= control target key end

     0   :  { %6 = vsyncpa [#allocation3], 0  ;;  %s499_s0 = inlined_call_operand.hbm [shape: f32[2,4,256], index: 0, kind: input, shape index: {}]   ;;  %s500_s1 = inlined_call_operand.hbm [shape: f32[2,4,256], index: 1, kind: output, shape index: {}]  }
   0x1   :  { %7 = vsyncpa [#allocation4], 0  ;;  %s450_s6 = smov [#allocation2]   ;;  %s402_s10 = scalar_lea.hbm %s499_s0, 256 }
   0x2   :  { %s13_s7 = sshll.u32 %s450_s6, 4  ;;  %p403_p0 = scmp.ne.s32.totalorder %s499_s0, %s402_s10  ;;  %s14_s7 = int_to_ptr.vmem [resolvable:$true] %s13_s7 }
   0x3   :  { %p406_p1 = scmp.lt.u32.totalorder %s402_s10, %s499_s0 }
   0x5   :  { %p408_p2 = pnand %p406_p1, %p403_p0 }
   0x7   :  { %411 = shalt.err (!%p408_p2)
}
   0x8   :  { %s412_s15 = scalar_lea.vmem %s14_s7, 256  ;;  %p417_p4 = scmp.lt.s32.totalorder %s14_s7, %s14_s7 }
   0x9   :  { %p413_p3 = scmp.ne.s32.totalorder %s14_s7, %s412_s15  ;;  %p418_p5 = scmp.lt.s32.totalorder %s412_s15, %s412_s15 }
   0xb   :  { %p419_p6 = por %p418_p5, %p417_p4 }
   0xd   :  { %p420_p7 = pnand %p419_p6, %p413_p3 }
   0xf   :  { %423 = shalt.err (!%p420_p7)
}
  0x10   :  { %s451_s16 = smov 128   ;;  %s452_s17 = smov 8  }
  0x11   :  { %19 = dma.hbm_to_vmem [thread:$0]  %s499_s0, 256, %s14_s7, [#allocation3], %s451_s16, %s451_s16, %s452_s17  }
  0x12   :  { %446 = dma.done.wait [#allocation3], 256  }
  0x13   :  { %447 = vsyncadd [#allocation3], 4294967040  ;;  %v23_v0 = vld [vmem:[#allocation2] sm:$0xff]  ;;  %v24_v1 = vld [vmem:[#allocation2 + $0x8] sm:$0xff]  ;;  %vm173_vm0 = vcmask 27648   ;;  %vm200_vm1 = vcmask 1043456  }
  0x14   :  { %v26_v2 = vcombine.high %v23_v0, %v23_v0  ;;  %v99_v3 = vcombine.high %v24_v1, %v24_v1  ;;  %v453_v22 = vmov 0.0   ;;  %vm196_vm2 = vcmask 31744   ;;  %s454_s0 = smov [#allocation5]  }
  0x15   :  { %s369_s20 = sshll.u32 %s454_s0, 4  ;;  %s370_s20 = int_to_ptr.vmem [resolvable:$true] %s369_s20 }
  0x16   :  { %28 = vmatprep.subr.mxu0 %v26_v2  ;;  %92 = vmatprep.mubr.f32.mxu0 %v26_v2  ;;  %s424_s21 = scalar_lea.vmem %s370_s20, 256  ;;  %p429_p9 = scmp.lt.s32.totalorder %s370_s20, %s370_s20 }
  0x17   :  { %29 = vmatpush1.xpose.msra.mxu0 %v23_v0  ;;  %101 = vmatprep.subr.mxu1 %v99_v3  ;;  %p425_p8 = scmp.ne.s32.totalorder %s370_s20, %s424_s21  ;;  %p430_p10 = scmp.lt.s32.totalorder %s424_s21, %s424_s21 }
  0x18   :  { %102 = vmatpush1.xpose.msra.mxu1 %v24_v1  ;;  %165 = vmatprep.mubr.f32.mxu1 %v99_v3 }
  0x19   :  { %381 = vmatprep.subr.msk.mxu0 %vm200_vm1, %v26_v2  ;;  %384 = vmatprep.subr.msk.mxu1 %vm200_vm1, %v99_v3  ;;  %p431_p11 = por %p430_p10, %p429_p9 }
  0x1a   :  { %93 = vmatmul.mubr.f32.vlgmr.msra.gmra.mrb[0].mxu0 %v23_v0 }
  0x1b   :  { %166 = vmatmul.mubr.f32.vlgmr.msra.gmra.mrb[0].mxu1 %v24_v1  ;;  %382 = vmatpush1.msk.msra.mxu0 %vm200_vm1, %v23_v0  ;;  %p432_p12 = pnand %p431_p11, %p425_p8 }
  0x1c   :  { %269 = vmatprep.mubr.f32.mxu0 %v453_v22  ;;  %385 = vmatpush1.msk.msra.mxu1 %vm200_vm1, %v24_v1 }
  0x1d   :  { %347 = vmatprep.mubr.f32.mxu1 %v453_v22 }
  0xed   :  { %v94_v4 = vpop.f32.mrb[0].mxu0 }
  0xee   :  { %v171_v5 = vmul.f32 0.044194173, %v94_v4  ;;  %v96_v6 = vpop.f32.mrb[1].mxu0  ;;  %v167_v7 = vpop.f32.mrb[0].mxu1 }
  0xef   :  { %v172_v8 = vmul.f32 0.044194173, %v167_v7  ;;  %v169_v9 = vpop.f32.mrb[1].mxu1 }
  0xf0   :  { %v174_v10 = vsel %vm173_vm0, %v171_v5, -inf }
  0xf1   :  { %175 = vmax.xlane.f32.xlu0 %v174_v10  ;;  %v177_v11 = vsel %vm173_vm0, %v172_v8, -inf }
  0xf5   :  { %178 = vmax.xlane.f32.xlu0 %v177_v11 }
 0x17e   :  { %v176_v12 = vpop.xlane.xlu0 %175 }
 0x17f   :  { %v180_v13 = vsub.f32 %v171_v5, %v176_v12 }
 0x181   :  { %v182_v14 = vmul.f32 1.442695, %v180_v13 }
 0x182   :  { %v179_v15 = vpop.xlane.xlu0 %178 }
 0x183   :  { %394 = vpow2.f32 %v182_v14  ;;  %v181_v16 = vsub.f32 %v172_v8, %v179_v15 }
 0x185   :  { %v184_v17 = vmul.f32 1.442695, %v181_v16 }
 0x187   :  { %396 = vpow2.f32 %v184_v17 }
 0x18d   :  { %v395_v18 = vpop.eup %394 }
 0x18e   :  { %v186_v19 = vsel %vm173_vm0, %v395_v18, 0.0 }
 0x18f   :  { %187 = vadd.xlane.f32.xlu1 %v186_v19 }
 0x191   :  { %v397_v20 = vpop.eup %396 }
 0x192   :  { %v189_v21 = vsel %vm173_vm0, %v397_v20, 0.0 }
 0x193   :  { %190 = vadd.xlane.f32.xlu1 %v189_v21 }
 0x21c   :  { %v188_v23 = vpop.xlane.xlu1 %187 }
 0x21d   :  { %398 = vrcp.f32 %v188_v23 }
 0x220   :  { %v191_v24 = vpop.xlane.xlu1 %190 }
 0x221   :  { %400 = vrcp.f32 %v191_v24 }
 0x227   :  { %v399_v25 = vpop.eup %398 }
 0x228   :  { %v194_v26 = vmul.f32 %v399_v25, %v395_v18 }
 0x22a   :  { %383 = vmatmul.mubr.msk.f32.vlgmr.msra.gmra.mrb[2].mxu0 %vm196_vm2, %v194_v26 }
 0x22b   :  { %v401_v27 = vpop.eup %400 }
 0x22c   :  { %v195_v28 = vmul.f32 %v401_v27, %v397_v20 }
 0x22e   :  { %386 = vmatmul.mubr.msk.f32.vlgmr.msra.gmra.mrb[2].mxu1 %vm196_vm2, %v195_v28 }
 0x2fd   :  { %v271_v29 = vpop.f32.mrb[2].mxu0 }
 0x2fe   :  { %v273_v30 = vpop.f32.mrb[3].mxu0 }
 0x2ff   :  { %v358_v31 = vcombine.low %v271_v29, %v273_v30 }
 0x301   :  { %362 = vst [vmem:[#allocation5] sm:$0xff] %v358_v31  ;;  %v349_v32 = vpop.f32.mrb[2].mxu1 }
 0x302   :  { %v351_v33 = vpop.f32.mrb[3].mxu1 }
 0x303   :  { %v359_v34 = vcombine.low %v349_v32, %v351_v33 }
 0x305   :  { %363 = vst [vmem:[#allocation5 + $0x8] sm:$0xff] %v359_v34 }
 0x306   :  { %435 = shalt.err (!%p432_p12)
}
 0x307   :  { %s436_s24 = scalar_lea.hbm %s500_s1, 256 }
 0x308   :  { %p437_p13 = scmp.ne.s32.totalorder %s500_s1, %s436_s24  ;;  %p440_p0 = scmp.lt.u32.totalorder %s436_s24, %s500_s1 }
 0x30a   :  { %p442_p1 = pnand %p440_p0, %p437_p13 }
 0x30c   :  { %445 = shalt.err (!%p442_p1)
}
 0x30d   :  { %375 = dma.vmem_to_hbm [thread:$0]  %s370_s20, 256, %s500_s1, [#allocation4], %s451_s16, %s451_s16, %s452_s17  }
 0x30e   :  { %448 = dma.done.wait [#allocation4], 256  }
 0x30f   :  { %449 = vsyncadd [#allocation4], 4294967040 }
 0x310   :  { %379 = vsyncpa [#allocation3], 1 }
 0x311   :  { %380 = vsyncpa [#allocation4], 1 }

</bundles_post_ra>
